<compile_context>
chip_gen: v7x
topology: tpu7x:2x2x1
jax: 0.10.0
libtpu: 0.0.40
codegen_flags: <defaults>
</compile_context>

<pallas_src>
import functools

import jax
import jax.numpy as jnp
from jax import lax
from jax.experimental import pallas as pl
from jax.experimental.pallas import tpu as pltpu

N_NODES = 16
IN_FEATURES = 8
HIDDEN = 32
LATENT = 32
ODE_STEPS = 8

# ---- packed node-data slab  f32 [N, 128]: A @ lane 0, x @ lane 32, eps @ lane 64 ----
_A_OFF, _X_OFF, _EPS_OFF = 0, 32, 64
_NODE_W = 128

# ---- packed weight/bias slab  f32 [112, 128], row-stacked (8-aligned weight rows) ----
_R_WENC, _R_WHEAD, _R_WDYN, _R_WDEC, _R_BIAS = 0, 8, 40, 72, 104
_WB_ROWS = 112

# ---- packed output  f32 [N, 256]: two 128-lane-aligned groups ----
#  group 0 (stored BEFORE the ODE loop): z_eff | mu | log_var | z_batch  (= 128 lanes)
#  group 1 (stored AFTER the ODE loop) : z_t1 | x0_rec | x1_rec | pad
_OFF_ZEFF, _OFF_MU, _OFF_LV, _OFF_ZB = 0, 32, 64, 96
_OFF_ZT1, _OFF_X0, _OFF_X1 = 128, 160, 168
_PACK_W = 256

_VMEM = pl.BlockSpec(memory_space=pltpu.MemorySpace.VMEM)
_SMEM = pl.BlockSpec(memory_space=pltpu.MemorySpace.SMEM)


# ----------------------------- fused Pallas kernel ----------------------------
def _combined_kernel(dt_ref, nodes_ref, wb_ref, o_ref, *, n_steps, is_variational):
    """Entire CombinedModel forward; 3 input DMAs, 2 lane-aligned output stores."""
    f32, bf16 = jnp.float32, jnp.bfloat16
    n = N_NODES

    # loop-invariant bf16 MXU operands (single-pass matmuls); everything else f32
    a_bf = nodes_ref[:, _A_OFF:_A_OFF + n].astype(bf16)                    # [N, N]
    x_bf = nodes_ref[:, _X_OFF:_X_OFF + IN_FEATURES].astype(bf16)          # [N, F]

    # ---- encoder: h = relu(A @ (X @ W_enc) + b_enc) ----
    xw = jnp.dot(x_bf,
                 wb_ref[_R_WENC:_R_WENC + IN_FEATURES, 0:HIDDEN].astype(bf16),
                 preferred_element_type=f32)
    h = jnp.dot(a_bf, xw.astype(bf16), preferred_element_type=f32) \
        + wb_ref[_R_BIAS:_R_BIAS + 1, 0:HIDDEN]
    h = jnp.maximum(h, 0.0)

    # ---- fused heads: [mu | log_var] = h @ [W_mu | W_lv] + [b_mu | b_lv] ----
    head = jnp.dot(h.astype(bf16),
                   wb_ref[_R_WHEAD:_R_WHEAD + HIDDEN, 0:2 * LATENT].astype(bf16),
                   preferred_element_type=f32) \
        + wb_ref[_R_BIAS + 1:_R_BIAS + 2, 0:2 * LATENT]
    mu = head[:, 0:LATENT]
    log_var = head[:, LATENT:2 * LATENT]

    # ---- variational reparameterization (exp -> EUP slot), kept in f32 ----
    if is_variational:
        eps = nodes_ref[:, _EPS_OFF:_EPS_OFF + LATENT]
        z_eff = mu + jnp.exp(0.5 * log_var) * eps
        initial_z = mu                         # PyTorch: dynamics start from mu when variational
    else:
        z_eff = mu
        initial_z = mu

    # mean pool over nodes, broadcast to rows for the packed store
    zb_rows = jnp.broadcast_to(jnp.mean(z_eff, axis=0, keepdims=True), (n, LATENT))

    # early 128-lane-aligned unmasked store of all ODE-independent results
    o_ref[:, 0:128] = jnp.concatenate([z_eff, mu, log_var, zb_rows], axis=-1)

    # ---- NeuralODE: explicit Euler, f32 carry in vregs, invariants hoisted, unrolled ----
    dt = dt_ref[0]                                                         # (t1 - t0)/n_steps
    w_dyn_bf = wb_ref[_R_WDYN:_R_WDYN + LATENT, 0:LATENT].astype(bf16)
    b_dyn_b = jnp.broadcast_to(wb_ref[_R_BIAS + 2:_R_BIAS + 3, 0:LATENT], (n, LATENT))

    def euler_step(_, z):
        msg = jnp.dot(a_bf, z.astype(bf16), preferred_element_type=f32)
        dz = jnp.tanh(jnp.dot(msg.astype(bf16), w_dyn_bf,
                              preferred_element_type=f32) + b_dyn_b)
        return z + dt * dz

    z_t1 = lax.fori_loop(0, n_steps, euler_step, initial_z, unroll=True)

    # ---- decoders: one fused [z_eff; z_t1] @ W_dec, then two tiny A@ matmuls ----
    # (decoder weights loaded only now, after the loop -> shorter live ranges)
    w_dec_bf = wb_ref[_R_WDEC:_R_WDEC + LATENT, 0:IN_FEATURES].astype(bf16)
    b_dec = wb_ref[_R_BIAS + 3:_R_BIAS + 4, 0:IN_FEATURES]
    z_stack = jnp.concatenate([z_eff, z_t1], axis=0).astype(bf16)          # [2N, L]
    zw = jnp.dot(z_stack, w_dec_bf, preferred_element_type=f32)            # [2N, F]
    x0_rec = jnp.dot(a_bf, zw[0:n].astype(bf16), preferred_element_type=f32) + b_dec
    x1_rec = jnp.dot(a_bf, zw[n:2 * n].astype(bf16), preferred_element_type=f32) + b_dec

    pad = jnp.zeros((n, 128 - (LATENT + 2 * IN_FEATURES)), f32)
    o_ref[:, 128:256] = jnp.concatenate([z_t1, x0_rec, x1_rec, pad], axis=-1)


# ------------------------------- packing (wrapper) -----------------------------
def pack_param_slab(params):
    """Pack all weights + biases into one row-stacked f32 [112, 128] slab (built once)."""
    wb = jnp.zeros((_WB_ROWS, 128), jnp.float32)
    wb = wb.at[_R_WENC:_R_WENC + IN_FEATURES, 0:HIDDEN].set(params["w_enc"])
    wb = wb.at[_R_WHEAD:_R_WHEAD + HIDDEN, 0:2 * LATENT].set(
        jnp.concatenate([params["w_mu"], params["w_lv"]], axis=1))
    wb = wb.at[_R_WDYN:_R_WDYN + LATENT, 0:LATENT].set(params["w_dyn"])
    wb = wb.at[_R_WDEC:_R_WDEC + LATENT, 0:IN_FEATURES].set(params["w_dec"])
    wb = wb.at[_R_BIAS, 0:HIDDEN].set(params["b_enc"][0])
    wb = wb.at[_R_BIAS + 1, 0:2 * LATENT].set(
        jnp.concatenate([params["b_mu"], params["b_lv"]], axis=1)[0])
    wb = wb.at[_R_BIAS + 2, 0:LATENT].set(params["b_dyn"][0])
    wb = wb.at[_R_BIAS + 3, 0:IN_FEATURES].set(params["b_dec"][0])
    return wb


def pack_node_slab(a, x, eps):
    """Pack A | x | eps into one f32 [N, 128] lane-aligned slab (one DMA)."""
    s = jnp.zeros((N_NODES, _NODE_W), jnp.float32)
    s = s.at[:, _A_OFF:_A_OFF + N_NODES].set(a)
    s = s.at[:, _X_OFF:_X_OFF + IN_FEATURES].set(x)
    s = s.at[:, _EPS_OFF:_EPS_OFF + LATENT].set(eps)
    return s


def combined_fused(wb_slab, node_slab, dt, *, is_variational=True, n_steps=ODE_STEPS):
    dt_arr = jnp.reshape(jnp.asarray(dt, jnp.float32), (1,))
    packed = pl.pallas_call(
        functools.partial(_combined_kernel, n_steps=n_steps,
                          is_variational=is_variational),
        out_shape=jax.ShapeDtypeStruct((N_NODES, _PACK_W), jnp.float32),
        in_specs=[_SMEM, _VMEM, _VMEM],
        out_specs=_VMEM,
    )(dt_arr, node_slab, wb_slab)

    # wrapper-side slicing of the packed slab (pure layout plumbing, no compute)
    return {
        "z_eff": packed[:, _OFF_ZEFF:_OFF_ZEFF + LATENT],
        "mu": packed[:, _OFF_MU:_OFF_MU + LATENT],
        "log_var": packed[:, _OFF_LV:_OFF_LV + LATENT],
        "z_batch": packed[0:1, _OFF_ZB:_OFF_ZB + LATENT],
        "z_t1": packed[:, _OFF_ZT1:_OFF_ZT1 + LATENT],
        "x0_rec": packed[:, _OFF_X0:_OFF_X0 + IN_FEATURES],
        "x1_rec": packed[:, _OFF_X1:_OFF_X1 + IN_FEATURES],
    }


# ------------------------------- JAX glue -------------------------------------
def build_norm_adjacency(edge_index, edge_weight, n):
    a = jnp.zeros((n, n), jnp.float32)
    a = a.at[edge_index[0], edge_index[1]].add(edge_weight)
    a = a + jnp.eye(n, dtype=jnp.float32)          # self loops
    deg = jnp.sum(a, axis=1, keepdims=True)
    return a / jnp.maximum(deg, 1e-6)              # row-normalized (GCN-style)


def init_params(key):
    ks = jax.random.split(key, 5)
    s = 0.1
    return {
        "w_enc": s * jax.random.normal(ks[0], (IN_FEATURES, HIDDEN), jnp.float32),
        "b_enc": jnp.zeros((1, HIDDEN), jnp.float32),
        "w_mu": s * jax.random.normal(ks[1], (HIDDEN, LATENT), jnp.float32),
        "b_mu": jnp.zeros((1, LATENT), jnp.float32),
        "w_lv": s * jax.random.normal(ks[2], (HIDDEN, LATENT), jnp.float32),
        "b_lv": jnp.zeros((1, LATENT), jnp.float32),
        "w_dyn": s * jax.random.normal(ks[3], (LATENT, LATENT), jnp.float32),
        "b_dyn": jnp.zeros((1, LATENT), jnp.float32),
        "w_dec": s * jax.random.normal(ks[4], (LATENT, IN_FEATURES), jnp.float32),
        "b_dec": jnp.zeros((1, IN_FEATURES), jnp.float32),
    }


def combined_model_forward(params, x_t0, edge_index, edge_weight, t0_scalar, t1_scalar,
                           rng, is_variational=True, num_ot_reg_intervals=0,
                           joint_training_mode="end_to_end", wb_slab=None):
    n = x_t0.shape[0]
    a = build_norm_adjacency(edge_index, edge_weight, n)

    # reparameterization noise, Euler step size, and input packing happen in the wrapper;
    # the fused kernel does all matmuls / exp / tanh / pooling.
    eps = (jax.random.normal(rng, (n, LATENT), jnp.float32)
           if is_variational else jnp.zeros((n, LATENT), jnp.float32))
    dt = (jnp.asarray(t1_scalar, jnp.float32) - jnp.asarray(t0_scalar, jnp.float32)) / ODE_STEPS

    if wb_slab is None:
        wb_slab = pack_param_slab(params)
    node_slab = pack_node_slab(a, x_t0, eps)

    fused = combined_fused(wb_slab, node_slab, dt,
                           is_variational=is_variational, n_steps=ODE_STEPS)

    pooling_details_t0 = [{"edge_index_after_pool": edge_index,
                           "edge_attr_after_pool": edge_weight}]
    # NeuralODE path: no CNF regularizers / trajectory
    delta_logp = kinetic_energy = jacobian_reg = z_trajectory = None

    outputs = {
        "z_t0_nodes_sampled_or_deterministic": fused["z_eff"],
        "mu_t0_nodes": fused["mu"] if is_variational else None,
        "log_var_t0_nodes": fused["log_var"] if is_variational else None,
        "z_t0_batch": fused["z_batch"],
        "pooling_details_t0": pooling_details_t0,
        "z_t1_predicted_nodes": fused["z_t1"],
        "delta_logp_t1": delta_logp,
        "kinetic_energy": kinetic_energy,
        "jacobian_reg": jacobian_reg,
        "z_trajectory_solutions": z_trajectory,
    }

    if joint_training_mode == "end_to_end":
        outputs["x_t0_reconstructed_params"] = fused["x0_rec"]
        outputs["x_t1_predicted_reconstructed_params"] = fused["x1_rec"]
    else:
        outputs["x_t0_reconstructed_params"] = None
        outputs["x_t1_predicted_reconstructed_params"] = None
    return outputs


# ------------------------------ reference (pure JAX) ---------------------------
def _reference_forward(params, x_t0, a, t0, t1, eps, use_bf16_matmuls=True):
    """Pure-JAX reference; mirrors the kernel's bf16-operand / f32-accumulate matmuls."""
    def mm(lhs, rhs):
        if use_bf16_matmuls:
            lhs = lhs.astype(jnp.bfloat16)
            rhs = rhs.astype(jnp.bfloat16)
        return jnp.dot(lhs, rhs, preferred_element_type=jnp.float32)

    h = jnp.maximum(mm(a, mm(x_t0, params["w_enc"])) + params["b_enc"], 0.0)
    mu = mm(h, params["w_mu"]) + params["b_mu"]
    log_var = mm(h, params["w_lv"]) + params["b_lv"]
    z_eff = mu + jnp.exp(0.5 * log_var) * eps
    z = mu
    dt = (t1 - t0) / ODE_STEPS
    for _ in range(ODE_STEPS):
        z = z + dt * jnp.tanh(mm(mm(a, z), params["w_dyn"]) + params["b_dyn"])
    x0_rec = mm(a, mm(z_eff, params["w_dec"])) + params["b_dec"]
    x1_rec = mm(a, mm(z, params["w_dec"])) + params["b_dec"]
    z_batch = jnp.mean(z_eff, axis=0, keepdims=True)
    return mu, z_eff, z, x0_rec, x1_rec, z_batch


if __name__ == "__main__":
    key = jax.random.PRNGKey(0)
    kx, kp, ke = jax.random.split(key, 3)

    x_t0 = jax.random.normal(kx, (N_NODES, IN_FEATURES), jnp.float32)
    src = jnp.arange(N_NODES, dtype=jnp.int32)
    dst = (src + 1) % N_NODES
    edge_index = jnp.stack([jnp.concatenate([src, dst]), jnp.concatenate([dst, src])])
    edge_weight = jnp.ones((edge_index.shape[1],), jnp.float32)
    t0_scalar = jnp.float32(0.0)
    t1_scalar = jnp.float32(1.0)

    params = init_params(kp)
    wb_slab = pack_param_slab(params)          # packed once, reused across calls

    outputs = combined_model_forward(params, x_t0, edge_index, edge_weight,
                                     t0_scalar, t1_scalar, rng=ke, wb_slab=wb_slab)
    outputs = jax.block_until_ready(outputs)

    # correctness checks
    a = build_norm_adjacency(edge_index, edge_weight, N_NODES)
    eps = jax.random.normal(ke, (N_NODES, LATENT), jnp.float32)

    def _err(x, y):
        return float(jnp.max(jnp.abs(x - y)))

    def _checks(ref):
        mu_r, zeff_r, zt1_r, x0_r, x1_r, zb_r = ref
        return [
            _err(outputs["mu_t0_nodes"], mu_r),
            _err(outputs["z_t0_nodes_sampled_or_deterministic"], zeff_r),
            _err(outputs["z_t1_predicted_nodes"], zt1_r),
            _err(outputs["x_t0_reconstructed_params"], x0_r),
            _err(outputs["x_t1_predicted_reconstructed_params"], x1_r),
            _err(outputs["z_t0_batch"], zb_r),
        ]

    # 1) against a reference that mirrors the kernel's mixed precision (tight)
    checks_bf16 = _checks(_reference_forward(params, x_t0, a, 0.0, 1.0, eps,
                                             use_bf16_matmuls=True))
    assert max(checks_bf16) < 1e-2, f"mismatch vs bf16-matched reference: {checks_bf16}"

    # 2) against the full-f32 reference (loose: bounds bf16-matmul drift)
    checks_f32 = _checks(_reference_forward(params, x_t0, a, 0.0, 1.0, eps,
                                            use_bf16_matmuls=False))
    assert max(checks_f32) < 5e-2, f"excessive bf16 drift vs f32 reference: {checks_f32}"

    print("KERNEL_OK")
</pallas_src>

<mosaic_0001>
module attributes {stable_mosaic.version = 11 : i64} {
  func.func @_combined_kernel(%arg0: memref<1xf32, #tpu.memory_space<smem>>, %arg1: memref<16x128xf32, #tpu.memory_space<vmem>>, %arg2: memref<112x128xf32, #tpu.memory_space<vmem>>, %arg3: memref<16x256xf32, #tpu.memory_space<vmem>>) attributes {dimension_semantics = [], scalar_prefetch = 0 : i64, scratch_operands = 0 : i64, tpu.core_type = #tpu.core_type<tc>} {
    %c0 = arith.constant 0 : index
    %c0_0 = arith.constant 0 : index
    %0 = vector.load %arg1[%c0, %c0_0] : memref<16x128xf32, #tpu.memory_space<vmem>>, vector<16x16xf32>
    %1 = arith.truncf %0 : vector<16x16xf32> to vector<16x16xbf16>
    %c0_1 = arith.constant 0 : index
    %c32 = arith.constant 32 : index
    %2 = vector.load %arg1[%c0_1, %c32] : memref<16x128xf32, #tpu.memory_space<vmem>>, vector<16x8xf32>
    %3 = arith.truncf %2 : vector<16x8xf32> to vector<16x8xbf16>
    %c0_2 = arith.constant 0 : index
    %c0_3 = arith.constant 0 : index
    %4 = vector.load %arg2[%c0_2, %c0_3] : memref<112x128xf32, #tpu.memory_space<vmem>>, vector<8x32xf32>
    %5 = arith.truncf %4 : vector<8x32xf32> to vector<8x32xbf16>
    %cst = arith.constant dense<0.000000e+00> : vector<16x32xf32>
    %6 = tpu.matmul %3, %5, %cst {dimension_numbers = #tpu.dot_dimension_numbers<[1], [0], [0], [1], [0, 0, 1, 1], [], []>} : vector<16x8xbf16>, vector<8x32xbf16>, vector<16x32xf32> -> vector<16x32xf32>
    %7 = arith.truncf %6 : vector<16x32xf32> to vector<16x32xbf16>
    %cst_4 = arith.constant dense<0.000000e+00> : vector<16x32xf32>
    %8 = tpu.matmul %1, %7, %cst_4 {dimension_numbers = #tpu.dot_dimension_numbers<[1], [0], [0], [1], [0, 0, 1, 1], [], []>} : vector<16x16xbf16>, vector<16x32xbf16>, vector<16x32xf32> -> vector<16x32xf32>
    %c104 = arith.constant 104 : index
    %c0_5 = arith.constant 0 : index
    %9 = vector.load %arg2[%c104, %c0_5] : memref<112x128xf32, #tpu.memory_space<vmem>>, vector<1x32xf32>
    %10 = vector.broadcast %9 : vector<1x32xf32> to vector<16x32xf32>
    %11 = arith.addf %8, %10 : vector<16x32xf32>
    %cst_6 = arith.constant 0.000000e+00 : f32
    %12 = vector.broadcast %cst_6 : f32 to vector<16x32xf32>
    %13 = arith.maximumf %11, %12 : vector<16x32xf32>
    %14 = arith.truncf %13 : vector<16x32xf32> to vector<16x32xbf16>
    %c8 = arith.constant 8 : index
    %c0_7 = arith.constant 0 : index
    %15 = vector.load %arg2[%c8, %c0_7] : memref<112x128xf32, #tpu.memory_space<vmem>>, vector<32x64xf32>
    %16 = arith.truncf %15 : vector<32x64xf32> to vector<32x64xbf16>
    %cst_8 = arith.constant dense<0.000000e+00> : vector<16x64xf32>
    %17 = tpu.matmul %14, %16, %cst_8 {dimension_numbers = #tpu.dot_dimension_numbers<[1], [0], [0], [1], [0, 0, 1, 1], [], []>} : vector<16x32xbf16>, vector<32x64xbf16>, vector<16x64xf32> -> vector<16x64xf32>
    %c105 = arith.constant 105 : index
    %c0_9 = arith.constant 0 : index
    %18 = vector.load %arg2[%c105, %c0_9] : memref<112x128xf32, #tpu.memory_space<vmem>>, vector<1x64xf32>
    %19 = vector.broadcast %18 : vector<1x64xf32> to vector<16x64xf32>
    %20 = arith.addf %17, %19 : vector<16x64xf32>
    %21 = vector.extract_strided_slice %20 {offsets = [0, 0], sizes = [16, 32], strides = [1, 1]} : vector<16x64xf32> to vector<16x32xf32>
    %22 = vector.extract_strided_slice %20 {offsets = [0, 32], sizes = [16, 32], strides = [1, 1]} : vector<16x64xf32> to vector<16x32xf32>
    %c0_10 = arith.constant 0 : index
    %c64 = arith.constant 64 : index
    %23 = vector.load %arg1[%c0_10, %c64] : memref<16x128xf32, #tpu.memory_space<vmem>>, vector<16x32xf32>
    %cst_11 = arith.constant 5.000000e-01 : f32
    %24 = vector.broadcast %cst_11 : f32 to vector<16x32xf32>
    %25 = arith.mulf %24, %22 : vector<16x32xf32>
    %26 = math.exp %25 : vector<16x32xf32>
    %27 = arith.mulf %26, %23 : vector<16x32xf32>
    %28 = arith.addf %21, %27 : vector<16x32xf32>
    %cst_12 = arith.constant dense<0.000000e+00> : vector<32xf32>
    %29 = vector.multi_reduction <add>, %28, %cst_12 [0] : vector<16x32xf32> to vector<32xf32>
    %30 = vector.shape_cast %29 : vector<32xf32> to vector<1x32xf32>
    %cst_13 = arith.constant 1.600000e+01 : f32
    %31 = vector.broadcast %cst_13 : f32 to vector<1x32xf32>
    %32 = arith.divf %30, %31 : vector<1x32xf32>
    %33 = vector.shape_cast %32 : vector<1x32xf32> to vector<1x32xf32>
    %34 = vector.broadcast %33 : vector<1x32xf32> to vector<16x32xf32>
    %35 = tpu.concatenate %28, %21, %22, %34 in 1 : vector<16x32xf32>, vector<16x32xf32>, vector<16x32xf32>, vector<16x32xf32> -> vector<16x128xf32>
    %c0_14 = arith.constant 0 : index
    %c0_15 = arith.constant 0 : index
    %36 = vector.load %arg3[%c0_14, %c0_15] : memref<16x256xf32, #tpu.memory_space<vmem>>, vector<16x128xf32>
    tpu.vector_store %arg3[%c0_14, %c0_15], %35 {strides = array<i32>} : memref<16x256xf32, #tpu.memory_space<vmem>>, vector<16x128xf32>,
    %c0_16 = arith.constant 0 : index
    %37 = memref.load %arg0[%c0_16] : memref<1xf32, #tpu.memory_space<smem>>
    %c40 = arith.constant 40 : index
    %c0_17 = arith.constant 0 : index
    %38 = vector.load %arg2[%c40, %c0_17] : memref<112x128xf32, #tpu.memory_space<vmem>>, vector<32x32xf32>
    %39 = arith.truncf %38 : vector<32x32xf32> to vector<32x32xbf16>
    %c106 = arith.constant 106 : index
    %c0_18 = arith.constant 0 : index
    %40 = vector.load %arg2[%c106, %c0_18] : memref<112x128xf32, #tpu.memory_space<vmem>>, vector<1x32xf32>
    %41 = vector.shape_cast %40 : vector<1x32xf32> to vector<1x32xf32>
    %42 = vector.broadcast %41 : vector<1x32xf32> to vector<16x32xf32>
    %c0_i32 = arith.constant 0 : i32
    %43 = arith.truncf %21 : vector<16x32xf32> to vector<16x32xbf16>
    %cst_19 = arith.constant dense<0.000000e+00> : vector<16x32xf32>
    %44 = tpu.matmul %1, %43, %cst_19 {dimension_numbers = #tpu.dot_dimension_numbers<[1], [0], [0], [1], [0, 0, 1, 1], [], []>} : vector<16x16xbf16>, vector<16x32xbf16>, vector<16x32xf32> -> vector<16x32xf32>
    %45 = arith.truncf %44 : vector<16x32xf32> to vector<16x32xbf16>
    %cst_20 = arith.constant dense<0.000000e+00> : vector<16x32xf32>
    %46 = tpu.matmul %45, %39, %cst_20 {dimension_numbers = #tpu.dot_dimension_numbers<[1], [0], [0], [1], [0, 0, 1, 1], [], []>} : vector<16x32xbf16>, vector<32x32xbf16>, vector<16x32xf32> -> vector<16x32xf32>
    %47 = arith.addf %46, %42 : vector<16x32xf32>
    %48 = math.tanh %47 : vector<16x32xf32>
    %49 = vector.broadcast %37 : f32 to vector<16x32xf32>
    %50 = arith.mulf %49, %48 : vector<16x32xf32>
    %51 = arith.addf %21, %50 : vector<16x32xf32>
    %c1_i32 = arith.constant 1 : i32
    %52 = arith.truncf %51 : vector<16x32xf32> to vector<16x32xbf16>
    %cst_21 = arith.constant dense<0.000000e+00> : vector<16x32xf32>
    %53 = tpu.matmul %1, %52, %cst_21 {dimension_numbers = #tpu.dot_dimension_numbers<[1], [0], [0], [1], [0, 0, 1, 1], [], []>} : vector<16x16xbf16>, vector<16x32xbf16>, vector<16x32xf32> -> vector<16x32xf32>
    %54 = arith.truncf %53 : vector<16x32xf32> to vector<16x32xbf16>
    %cst_22 = arith.constant dense<0.000000e+00> : vector<16x32xf32>
    %55 = tpu.matmul %54, %39, %cst_22 {dimension_numbers = #tpu.dot_dimension_numbers<[1], [0], [0], [1], [0, 0, 1, 1], [], []>} : vector<16x32xbf16>, vector<32x32xbf16>, vector<16x32xf32> -> vector<16x32xf32>
    %56 = arith.addf %55, %42 : vector<16x32xf32>
    %57 = math.tanh %56 : vector<16x32xf32>
    %58 = vector.broadcast %37 : f32 to vector<16x32xf32>
    %59 = arith.mulf %58, %57 : vector<16x32xf32>
    %60 = arith.addf %51, %59 : vector<16x32xf32>
    %c2_i32 = arith.constant 2 : i32
    %61 = arith.truncf %60 : vector<16x32xf32> to vector<16x32xbf16>
    %cst_23 = arith.constant dense<0.000000e+00> : vector<16x32xf32>
    %62 = tpu.matmul %1, %61, %cst_23 {dimension_numbers = #tpu.dot_dimension_numbers<[1], [0], [0], [1], [0, 0, 1, 1], [], []>} : vector<16x16xbf16>, vector<16x32xbf16>, vector<16x32xf32> -> vector<16x32xf32>
    %63 = arith.truncf %62 : vector<16x32xf32> to vector<16x32xbf16>
    %cst_24 = arith.constant dense<0.000000e+00> : vector<16x32xf32>
    %64 = tpu.matmul %63, %39, %cst_24 {dimension_numbers = #tpu.dot_dimension_numbers<[1], [0], [0], [1], [0, 0, 1, 1], [], []>} : vector<16x32xbf16>, vector<32x32xbf16>, vector<16x32xf32> -> vector<16x32xf32>
    %65 = arith.addf %64, %42 : vector<16x32xf32>
    %66 = math.tanh %65 : vector<16x32xf32>
    %67 = vector.broadcast %37 : f32 to vector<16x32xf32>
    %68 = arith.mulf %67, %66 : vector<16x32xf32>
    %69 = arith.addf %60, %68 : vector<16x32xf32>
    %c3_i32 = arith.constant 3 : i32
    %70 = arith.truncf %69 : vector<16x32xf32> to vector<16x32xbf16>
    %cst_25 = arith.constant dense<0.000000e+00> : vector<16x32xf32>
    %71 = tpu.matmul %1, %70, %cst_25 {dimension_numbers = #tpu.dot_dimension_numbers<[1], [0], [0], [1], [0, 0, 1, 1], [], []>} : vector<16x16xbf16>, vector<16x32xbf16>, vector<16x32xf32> -> vector<16x32xf32>
    %72 = arith.truncf %71 : vector<16x32xf32> to vector<16x32xbf16>
    %cst_26 = arith.constant dense<0.000000e+00> : vector<16x32xf32>
    %73 = tpu.matmul %72, %39, %cst_26 {dimension_numbers = #tpu.dot_dimension_numbers<[1], [0], [0], [1], [0, 0, 1, 1], [], []>} : vector<16x32xbf16>, vector<32x32xbf16>, vector<16x32xf32> -> vector<16x32xf32>
    %74 = arith.addf %73, %42 : vector<16x32xf32>
    %75 = math.tanh %74 : vector<16x32xf32>
    %76 = vector.broadcast %37 : f32 to vector<16x32xf32>
    %77 = arith.mulf %76, %75 : vector<16x32xf32>
    %78 = arith.addf %69, %77 : vector<16x32xf32>
    %c4_i32 = arith.constant 4 : i32
    %79 = arith.truncf %78 : vector<16x32xf32> to vector<16x32xbf16>
    %cst_27 = arith.constant dense<0.000000e+00> : vector<16x32xf32>
    %80 = tpu.matmul %1, %79, %cst_27 {dimension_numbers = #tpu.dot_dimension_numbers<[1], [0], [0], [1], [0, 0, 1, 1], [], []>} : vector<16x16xbf16>, vector<16x32xbf16>, vector<16x32xf32> -> vector<16x32xf32>
    %81 = arith.truncf %80 : vector<16x32xf32> to vector<16x32xbf16>
    %cst_28 = arith.constant dense<0.000000e+00> : vector<16x32xf32>
    %82 = tpu.matmul %81, %39, %cst_28 {dimension_numbers = #tpu.dot_dimension_numbers<[1], [0], [0], [1], [0, 0, 1, 1], [], []>} : vector<16x32xbf16>, vector<32x32xbf16>, vector<16x32xf32> -> vector<16x32xf32>
    %83 = arith.addf %82, %42 : vector<16x32xf32>
    %84 = math.tanh %83 : vector<16x32xf32>
    %85 = vector.broadcast %37 : f32 to vector<16x32xf32>
    %86 = arith.mulf %85, %84 : vector<16x32xf32>
    %87 = arith.addf %78, %86 : vector<16x32xf32>
    %c5_i32 = arith.constant 5 : i32
    %88 = arith.truncf %87 : vector<16x32xf32> to vector<16x32xbf16>
    %cst_29 = arith.constant dense<0.000000e+00> : vector<16x32xf32>
    %89 = tpu.matmul %1, %88, %cst_29 {dimension_numbers = #tpu.dot_dimension_numbers<[1], [0], [0], [1], [0, 0, 1, 1], [], []>} : vector<16x16xbf16>, vector<16x32xbf16>, vector<16x32xf32> -> vector<16x32xf32>
    %90 = arith.truncf %89 : vector<16x32xf32> to vector<16x32xbf16>
    %cst_30 = arith.constant dense<0.000000e+00> : vector<16x32xf32>
    %91 = tpu.matmul %90, %39, %cst_30 {dimension_numbers = #tpu.dot_dimension_numbers<[1], [0], [0], [1], [0, 0, 1, 1], [], []>} : vector<16x32xbf16>, vector<32x32xbf16>, vector<16x32xf32> -> vector<16x32xf32>
    %92 = arith.addf %91, %42 : vector<16x32xf32>
    %93 = math.tanh %92 : vector<16x32xf32>
    %94 = vector.broadcast %37 : f32 to vector<16x32xf32>
    %95 = arith.mulf %94, %93 : vector<16x32xf32>
    %96 = arith.addf %87, %95 : vector<16x32xf32>
    %c6_i32 = arith.constant 6 : i32
    %97 = arith.truncf %96 : vector<16x32xf32> to vector<16x32xbf16>
    %cst_31 = arith.constant dense<0.000000e+00> : vector<16x32xf32>
    %98 = tpu.matmul %1, %97, %cst_31 {dimension_numbers = #tpu.dot_dimension_numbers<[1], [0], [0], [1], [0, 0, 1, 1], [], []>} : vector<16x16xbf16>, vector<16x32xbf16>, vector<16x32xf32> -> vector<16x32xf32>
    %99 = arith.truncf %98 : vector<16x32xf32> to vector<16x32xbf16>
    %cst_32 = arith.constant dense<0.000000e+00> : vector<16x32xf32>
    %100 = tpu.matmul %99, %39, %cst_32 {dimension_numbers = #tpu.dot_dimension_numbers<[1], [0], [0], [1], [0, 0, 1, 1], [], []>} : vector<16x32xbf16>, vector<32x32xbf16>, vector<16x32xf32> -> vector<16x32xf32>
    %101 = arith.addf %100, %42 : vector<16x32xf32>
    %102 = math.tanh %101 : vector<16x32xf32>
    %103 = vector.broadcast %37 : f32 to vector<16x32xf32>
    %104 = arith.mulf %103, %102 : vector<16x32xf32>
    %105 = arith.addf %96, %104 : vector<16x32xf32>
    %c7_i32 = arith.constant 7 : i32
    %106 = arith.truncf %105 : vector<16x32xf32> to vector<16x32xbf16>
    %cst_33 = arith.constant dense<0.000000e+00> : vector<16x32xf32>
    %107 = tpu.matmul %1, %106, %cst_33 {dimension_numbers = #tpu.dot_dimension_numbers<[1], [0], [0], [1], [0, 0, 1, 1], [], []>} : vector<16x16xbf16>, vector<16x32xbf16>, vector<16x32xf32> -> vector<16x32xf32>
    %108 = arith.truncf %107 : vector<16x32xf32> to vector<16x32xbf16>
    %cst_34 = arith.constant dense<0.000000e+00> : vector<16x32xf32>
    %109 = tpu.matmul %108, %39, %cst_34 {dimension_numbers = #tpu.dot_dimension_numbers<[1], [0], [0], [1], [0, 0, 1, 1], [], []>} : vector<16x32xbf16>, vector<32x32xbf16>, vector<16x32xf32> -> vector<16x32xf32>
    %110 = arith.addf %109, %42 : vector<16x32xf32>
    %111 = math.tanh %110 : vector<16x32xf32>
    %112 = vector.broadcast %37 : f32 to vector<16x32xf32>
    %113 = arith.mulf %112, %111 : vector<16x32xf32>
    %114 = arith.addf %105, %113 : vector<16x32xf32>
    %c72 = arith.constant 72 : index
    %c0_35 = arith.constant 0 : index
    %115 = vector.load %arg2[%c72, %c0_35] : memref<112x128xf32, #tpu.memory_space<vmem>>, vector<32x8xf32>
    %116 = arith.truncf %115 : vector<32x8xf32> to vector<32x8xbf16>
    %c107 = arith.constant 107 : index
    %c0_36 = arith.constant 0 : index
    %117 = vector.load %arg2[%c107, %c0_36] : memref<112x128xf32, #tpu.memory_space<vmem>>, vector<1x8xf32>
    %118 = tpu.concatenate %28, %114 in 0 : vector<16x32xf32>, vector<16x32xf32> -> vector<32x32xf32>
    %119 = arith.truncf %118 : vector<32x32xf32> to vector<32x32xbf16>
    %cst_37 = arith.constant dense<0.000000e+00> : vector<32x8xf32>
    %120 = tpu.matmul %119, %116, %cst_37 {dimension_numbers = #tpu.dot_dimension_numbers<[1], [0], [0], [1], [0, 0, 1, 1], [], []>} : vector<32x32xbf16>, vector<32x8xbf16>, vector<32x8xf32> -> vector<32x8xf32>
    %121 = vector.extract_strided_slice %120 {offsets = [0, 0], sizes = [16, 8], strides = [1, 1]} : vector<32x8xf32> to vector<16x8xf32>
    %122 = arith.truncf %121 : vector<16x8xf32> to vector<16x8xbf16>
    %cst_38 = arith.constant dense<0.000000e+00> : vector<16x8xf32>
    %123 = tpu.matmul %1, %122, %cst_38 {dimension_numbers = #tpu.dot_dimension_numbers<[1], [0], [0], [1], [0, 0, 1, 1], [], []>} : vector<16x16xbf16>, vector<16x8xbf16>, vector<16x8xf32> -> vector<16x8xf32>
    %124 = vector.broadcast %117 : vector<1x8xf32> to vector<16x8xf32>
    %125 = arith.addf %123, %124 : vector<16x8xf32>
    %126 = vector.extract_strided_slice %120 {offsets = [16, 0], sizes = [16, 8], strides = [1, 1]} : vector<32x8xf32> to vector<16x8xf32>
    %127 = arith.truncf %126 : vector<16x8xf32> to vector<16x8xbf16>
    %cst_39 = arith.constant dense<0.000000e+00> : vector<16x8xf32>
    %128 = tpu.matmul %1, %127, %cst_39 {dimension_numbers = #tpu.dot_dimension_numbers<[1], [0], [0], [1], [0, 0, 1, 1], [], []>} : vector<16x16xbf16>, vector<16x8xbf16>, vector<16x8xf32> -> vector<16x8xf32>
    %129 = vector.broadcast %117 : vector<1x8xf32> to vector<16x8xf32>
    %130 = arith.addf %128, %129 : vector<16x8xf32>
    %cst_40 = arith.constant 0.000000e+00 : f32
    %131 = vector.broadcast %cst_40 : f32 to vector<16x80xf32>
    %132 = tpu.concatenate %114, %125, %130, %131 in 1 : vector<16x32xf32>, vector<16x8xf32>, vector<16x8xf32>, vector<16x80xf32> -> vector<16x128xf32>
    %c0_41 = arith.constant 0 : index
    %c128 = arith.constant 128 : index
    %133 = vector.load %arg3[%c0_41, %c128] : memref<16x256xf32, #tpu.memory_space<vmem>>, vector<16x128xf32>
    tpu.vector_store %arg3[%c0_41, %c128], %132 {strides = array<i32>} : memref<16x256xf32, #tpu.memory_space<vmem>>, vector<16x128xf32>,
    return
  }
}

</mosaic_0001>

<bundles_post_ra>
// kernel: tpu_custom_call.1
= control target key start
LH: loop header
LB: loop body
LE: loop exit
PB: predicated region body
PF: predicated region fallthrough
CT: control target
= control target key end

     0   :  { %9 = vsyncpa [#allocation4], 0  ;;  %s1868_s0 = inlined_call_operand.<no memory space> [shape: f32[1], index: 0, kind: input, shape index: {}]   ;;  %s1869_s1 = inlined_call_operand.hbm [shape: f32[16,128], index: 1, kind: input, shape index: {}]   ;;  %s1870_s2 = inlined_call_operand.hbm [shape: f32[112,128], index: 2, kind: input, shape index: {}]   ;;  %s1871_s3 = inlined_call_operand.hbm [shape: f32[16,256], index: 3, kind: output, shape index: {}]  }
   0x1   :  { %10 = vsyncpa [#allocation7], 0 }
   0x2   :  { %11 = vsyncpa [#allocation5], 0  ;;  %s1578_s12 = smov [#allocation3]   ;;  %s1506_s16 = scalar_lea.hbm %s1869_s1, 256 }
   0x3   :  { %s19_s13 = sshll.u32 %s1578_s12, 4  ;;  %p1507_p0 = scmp.ne.s32.totalorder %s1869_s1, %s1506_s16  ;;  %s20_s13 = int_to_ptr.vmem [resolvable:$true] %s19_s13 }
   0x4   :  { %p1510_p1 = scmp.lt.u32.totalorder %s1506_s16, %s1869_s1 }
   0x6   :  { %p1512_p2 = pnand %p1510_p1, %p1507_p0 }
   0x8   :  { %1515 = shalt.err (!%p1512_p2)
}
   0x9   :  { %s1516_s21 = scalar_lea.vmem %s20_s13, 256  ;;  %p1521_p4 = scmp.lt.s32.totalorder %s20_s13, %s20_s13 }
   0xa   :  { %p1517_p3 = scmp.ne.s32.totalorder %s20_s13, %s1516_s21  ;;  %p1522_p5 = scmp.lt.s32.totalorder %s1516_s21, %s1516_s21 }
   0xc   :  { %p1523_p6 = por %p1522_p5, %p1521_p4 }
   0xe   :  { %p1524_p7 = pnand %p1523_p6, %p1517_p3 }
  0x10   :  { %1527 = shalt.err (!%p1524_p7)
}
  0x11   :  { %s1579_s22 = smov 128   ;;  %s1580_s23 = smov 8  }
  0x12   :  { %25 = dma.hbm_to_vmem [thread:$0]  %s1869_s1, 256, %s20_s13, [#allocation4], %s1579_s22, %s1579_s22, %s1580_s23  }
  0x13   :  { %s1581_s26 = smov [#allocation6]   ;;  %s1528_s30 = scalar_lea.hbm %s1870_s2, 1792 }
  0x14   :  { %s31_s27 = sshll.u32 %s1581_s26, 4  ;;  %p1529_p8 = scmp.ne.s32.totalorder %s1870_s2, %s1528_s30  ;;  %s32_s27 = int_to_ptr.vmem [resolvable:$true] %s31_s27 }
  0x15   :  { %p1532_p9 = scmp.lt.u32.totalorder %s1528_s30, %s1870_s2 }
  0x17   :  { %p1534_p10 = pnand %p1532_p9, %p1529_p8 }
  0x19   :  { %1537 = shalt.err (!%p1534_p10)
}
  0x1a   :  { %s1538_s8 = scalar_lea.vmem %s32_s27, 1792  ;;  %p1543_p12 = scmp.lt.s32.totalorder %s32_s27, %s32_s27 }
  0x1b   :  { %p1539_p11 = scmp.ne.s32.totalorder %s32_s27, %s1538_s8  ;;  %p1544_p13 = scmp.lt.s32.totalorder %s1538_s8, %s1538_s8 }
  0x1d   :  { %p1545_p0 = por %p1544_p13, %p1543_p12 }
  0x1f   :  { %p1546_p1 = pnand %p1545_p0, %p1539_p11 }
  0x21   :  { %1549 = shalt.err (!%p1546_p1)
}
  0x22   :  { %37 = dma.hbm_to_vmem [thread:$0]  %s1870_s2, 1792, %s32_s27, [#allocation7], %s1579_s22, %s1579_s22, %s1580_s23  }
  0x23   :  { %1572 = dma.done.wait [#allocation4], 256  }
  0x24   :  { %1573 = vsyncadd [#allocation4], 4294967040 }
  0x25   :  { %1574 = dma.done.wait [#allocation7], 1792  }
  0x26   :  { %1575 = vsyncadd [#allocation7], 4294965504  ;;  %v1582_v0 = vmov 0.0   ;;  %vm1583_vm0 = vmmov 0   ;;  %v45_v1 = vld [vmem:[#allocation3] sm:$0xff]  ;;  %v46_v2 = vld [vmem:[#allocation3 + $0x8] sm:$0xff] }
  0x27   :  { %1306 = vmatprep.subr.bf16.mxu0 %v1582_v0  ;;  %1308 = vmatprep.mubr.msk.bf16.mxu0 %vm1583_vm0, %v1582_v0  ;;  %v48_v3 = vld [vmem:[#allocation6] sm:$0xff]  ;;  %vm57_vm1 = vcmask 1043456   ;;  %v1640_v4 = vpack.c.bf16 %v46_v2, %v45_v1  ;;  %s1584_s2 = smov 96   ;;  %vm53_vm2 = vcmask 64512   ;;  %vm108_vm3 = vcmask 130048   ;;  %v156_v13 = vld [vmem:[#allocation6 + $0x8] sm:$0xff] }
  0x28   :  { %1312 = vmatprep.subr.bf16.mxu1 %v1582_v0  ;;  %1314 = vmatprep.mubr.msk.bf16.mxu1 %vm1583_vm0, %v1582_v0  ;;  %v49_v5 = vpack.c.bf16 %v48_v3, %v48_v3  ;;  %v157_v14 = vld [vmem:[#allocation6 + $0x10] sm:$0xff]  ;;  %v158_v16 = vld [vmem:[#allocation6 + $0x18] sm:$0xff]  ;;  %v159_v17 = vld [vmem:[#allocation6 + $0x20] sm:$0xff]  ;;  %vm167_vm4 = vcmask 261120   ;;  %s1585_s10 = smov 32   ;;  %vm1198_vm5 = vcmask 326656  }
  0x29   :  { %222 = vrot.lane.b32.xlu1 %v46_v2, %s1584_s2  ;;  %51 = vrot.lane.b32.xlu0 %v1640_v4, %s1584_s2  ;;  %v160_v15 = vpack.c.bf16 %v157_v14, %v156_v13  ;;  %v161_v18 = vpack.c.bf16 %v159_v17, %v158_v16  ;;  %v1225_v19 = vld [vmem:[#allocation6 + $0x68] ss:$0 sm:$0xff]  ;;  %v1227_v29 = vld [vmem:[#allocation6 + $0x69] ss:$0 sm:$0xff]  ;;  %v273_v43 = vld [vmem:[#allocation6 + $0x30] sm:$0xff]  ;;  %vm1201_vm6 = vcmask 392192  }
  0x2a   :  { %v59_v6 = vsel %vm57_vm1, %v49_v5, 0  ;;  %v272_v42 = vld [vmem:[#allocation6 + $0x28] sm:$0xff]  ;;  %v274_v50 = vld [vmem:[#allocation6 + $0x38] sm:$0xff]  ;;  %v275_v51 = vld [vmem:[#allocation6 + $0x40] sm:$0xff]  ;;  %s1587_s13 = smov [#allocation8]   ;;  %vm263_vm7 = vcmask 523264  }
  0x2b   :  { %1307 = vmatpush3.bf16.msra.mxu0 %v59_v6  ;;  %v1672_v46 = vpack.c.bf16 %v273_v43, %v272_v42  ;;  %v1682_v52 = vpack.c.bf16 %v275_v51, %v274_v50  ;;  %v1705_v2 = vld [vmem:[#allocation6 + $0x6a] ss:$0 sm:$0xff]  ;;  %s1211_s14 = sshll.u32 %s1587_s13, 4  ;;  %vm266_vm8 = vcmask 785408   ;;  %s1847_s14 = int_to_ptr.vmem [resolvable:$true] %s1211_s14 }
  0x2c   :  { %1318 = vmatprep.subr.bf16.mxu0 %v1582_v0  ;;  %s1550_s15 = scalar_lea.vmem %s1847_s14, 512  ;;  %p1555_p3 = scmp.lt.s32.totalorder %s1847_s14, %s1847_s14 }
  0x2d   :  { %220 = vrot.lane.b32.xlu0 %v45_v1, %s1584_s2  ;;  %p1551_p2 = scmp.ne.s32.totalorder %s1847_s14, %s1550_s15  ;;  %p1556_p4 = scmp.lt.s32.totalorder %s1550_s15, %s1550_s15 }
  0x2f   :  { %p1557_p5 = por %p1556_p4, %p1555_p3 }
  0x31   :  { %p1558_p6 = pnand %p1557_p5, %p1551_p2 }
  0x9b   :  { %v52_v7 = vpop.permute.xlu0 %51  ;;  %v223_v45 = vpop.permute.xlu1 %222 }
  0x9c   :  { %1309 = vmatmul.mubr.msk.bf16.vlgmr.msra.gmra.mrb[0].mxu0 %vm53_vm2, %v52_v7 }
  0x9d   :  { %1322 = vmatprep.mubr.msk.bf16.mxu0 %vm1583_vm0, %v1582_v0  ;;  %1319 = vmatpush3.bf16.msra.mxu0 %v160_v15 }
  0x9e   :  { %1320 = vmatprep.subr.bf16.mxu0 %v1582_v0 }
  0x9f   :  { %v221_v41 = vpop.permute.xlu0 %220 }
  0xa1   :  { %1321 = vmatpush3.bf16.msra.mxu0 %v161_v18 }
  0xa2   :  { %1332 = vmatprep.subr.bf16.mxu0 %v1582_v0 }
 0x16f   :  { %v95_v8 = vpop.f32.mrb[0].mxu0 }
 0x170   :  { %v1310_v9 = vpop.f32.mrb[1].mxu0 }
 0x171   :  { %v98_v10 = vpop.f32.mrb[2].mxu0 }
 0x172   :  { %v102_v11 = vpack.c.bf16 %v98_v10, %v95_v8  ;;  %v1311_v12 = vpop.f32.mrb[3].mxu0  ;;  %v1712_v10 = vstv %s1868_s0  ;;  %s1586_s0 = smov 40  }
 0x174   :  { %1313 = vmatpush3.bf16.msra.mxu1 %v102_v11 }
 0x175   :  { %1326 = vmatprep.subr.bf16.mxu1 %v1582_v0 }
 0x177   :  { %1315 = vmatmul.mubr.msk.bf16.vlgmr.msra.gmra.mrb[0].mxu1 %vm108_vm3, %v1640_v4 }
 0x178   :  { %1328 = vmatprep.mubr.msk.bf16.mxu1 %vm1583_vm0, %v1582_v0 }
 0x24a   :  { %v146_v20 = vpop.f32.mrb[0].mxu1 }
 0x24b   :  { %v147_v21 = vadd.f32 %v1225_v19, %v146_v20  ;;  %v1316_v22 = vpop.f32.mrb[1].mxu1 }
 0x24c   :  { %v149_v23 = vpop.f32.mrb[2].mxu1 }
 0x24d   :  { %v150_v24 = vadd.f32 %v1225_v19, %v149_v23  ;;  %v1317_v25 = vpop.f32.mrb[3].mxu1  ;;  %v153_v26 = vmax.f32 %v147_v21, 0.0 }
 0x24f   :  { %v154_v27 = vmax.f32 %v150_v24, 0.0 }
 0x251   :  { %v155_v28 = vpack.c.bf16 %v154_v27, %v153_v26 }
 0x253   :  { %1323 = vmatmul.mubr.msk.bf16.vlgmr.msra.gmra.mrb[4].mxu0 %vm167_vm4, %v155_v28 }
 0x254   :  { %1336 = vmatprep.mubr.msk.bf16.mxu0 %vm1583_vm0, %v1582_v0  ;;  %1333 = vmatpush3.bf16.msra.mxu0 %v1672_v46 }
 0x255   :  { %1334 = vmatprep.subr.bf16.mxu0 %v1582_v0 }
 0x258   :  { %1335 = vmatpush3.bf16.msra.mxu0 %v1682_v52 }
 0x259   :  { %1346 = vmatprep.subr.bf16.mxu0 %v1582_v0 }
 0x326   :  { %v205_v30 = vpop.f32.mrb[4].mxu0 }
 0x327   :  { %v1659_v31 = vadd.f32 %v1227_v29, %v205_v30  ;;  %v1324_v32 = vpop.f32.mrb[5].mxu0 }
 0x328   :  { %v208_v33 = vpop.f32.mrb[6].mxu0 }
 0x329   :  { %v1661_v34 = vadd.f32 %v1227_v29, %v208_v33  ;;  %v1325_v35 = vpop.f32.mrb[7].mxu0  ;;  %v212_v36 = vmul.f32 0.5, %v1659_v31 }
 0x32b   :  { %v283_v37 = vpack.c.bf16 %v1661_v34, %v1659_v31  ;;  %v214_v38 = vmul.f32 1.442695, %v212_v36  ;;  %v213_v39 = vmul.f32 0.5, %v1661_v34 }
 0x32d   :  { %1327 = vmatpush3.bf16.msra.mxu1 %v283_v37  ;;  %1470 = vpow2.f32 %v214_v38  ;;  %v216_v40 = vmul.f32 1.442695, %v213_v39 }
 0x32e   :  { %1340 = vmatprep.subr.bf16.mxu1 %v1582_v0 }
 0x32f   :  { %1472 = vpow2.f32 %v216_v40 }
 0x330   :  { %1329 = vmatmul.mubr.msk.bf16.vlgmr.msra.gmra.mrb[4].mxu1 %vm108_vm3, %v1640_v4 }
 0x331   :  { %1342 = vmatprep.mubr.msk.bf16.mxu1 %vm1583_vm0, %v1582_v0 }
 0x337   :  { %v1471_v44 = vpop.eup %1470 }
 0x338   :  { %v226_v47 = vmul.f32 %v1471_v44, %v221_v41 }
 0x339   :  { %v1473_v48 = vpop.eup %1472 }
 0x33a   :  { %v227_v49 = vmul.f32 %v1473_v48, %v223_v45  ;;  %230 = vrot.lane.b32.xlu1 %v226_v47, %s1584_s2 }
 0x33c   :  { %232 = vrot.lane.b32.xlu0 %v227_v49, %s1584_s2 }
 0x33e   :  { %251 = vrot.lane.b32.xlu1 %v1659_v31, %s1585_s10 }
 0x340   :  { %253 = vrot.lane.b32.xlu0 %v1661_v34, %s1585_s10 }
 0x3ac   :  { %v231_v53 = vpop.permute.xlu1 %230 }
 0x3ad   :  { %v1687_v54 = vadd.f32 %v231_v53, %v1659_v31 }
 0x3ae   :  { %v233_v55 = vpop.permute.xlu0 %232 }
 0x3af   :  { %v1690_v56 = vadd.f32 %v233_v55, %v1661_v34  ;;  %v238_v57 = vsel %vm167_vm4, %v1687_v54, 0.0 }
 0x3b1   :  { %v239_v58 = vsel %vm167_vm4, %v1690_v56, 0.0 }
 0x3b2   :  { %v1696_v59 = vadd.f32 %v239_v58, %v238_v57 }
 0x403   :  { %v318_v60 = vpop.f32.mrb[4].mxu1 }
 0x404   :  { %v1330_v61 = vpop.f32.mrb[5].mxu1 }
 0x405   :  { %v321_v62 = vpop.f32.mrb[6].mxu1 }
 0x406   :  { %v325_v63 = vpack.c.bf16 %v321_v62, %v318_v60  ;;  %v1331_v1 = vpop.f32.mrb[7].mxu1 }
 0x408   :  { %1337 = vmatmul.mubr.msk.bf16.vlgmr.msra.gmra.mrb[8].mxu0 %vm167_vm4, %v325_v63 }
 0x409   :  { %1347 = vmatpush3.bf16.msra.mxu0 %v1672_v46  ;;  %1350 = vmatprep.mubr.msk.bf16.mxu0 %vm1583_vm0, %v1582_v0 }
 0x40a   :  { %1348 = vmatprep.subr.bf16.mxu0 %v1582_v0 }
 0x40d   :  { %1349 = vmatpush3.bf16.msra.mxu0 %v1682_v52 }
 0x40e   :  { %1360 = vmatprep.subr.bf16.mxu0 %v1582_v0 }
 0x4db   :  { %v363_v3 = vpop.f32.mrb[8].mxu0 }
 0x4dc   :  { %v364_v5 = vadd.f32 %v1705_v2, %v363_v3  ;;  %v1338_v6 = vpop.f32.mrb[9].mxu0 }
 0x4dd   :  { %v366_v7 = vpop.f32.mrb[10].mxu0 }
 0x4de   :  { %1474 = vtanh.f32 %v364_v5  ;;  %v367_v8 = vadd.f32 %v1705_v2, %v366_v7  ;;  %v1339_v9 = vpop.f32.mrb[11].mxu0 }
 0x4e0   :  { %1476 = vtanh.f32 %v367_v8 }
 0x4e8   :  { %v1475_v11 = vpop.eup %1474 }
 0x4e9   :  { %v373_v12 = vmul.f32 %v1475_v11, %v1712_v10 }
 0x4ea   :  { %v1477_v13 = vpop.eup %1476 }
 0x4eb   :  { %v374_v14 = vmul.f32 %v1477_v13, %v1712_v10  ;;  %v375_v15 = vadd.f32 %v373_v12, %v1659_v31 }
 0x4ed   :  { %v376_v16 = vadd.f32 %v374_v14, %v1661_v34 }
 0x4ef   :  { %v377_v17 = vpack.c.bf16 %v376_v16, %v375_v15 }
 0x4f1   :  { %1341 = vmatpush3.bf16.msra.mxu1 %v377_v17 }
 0x4f2   :  { %1354 = vmatprep.subr.bf16.mxu1 %v1582_v0 }
 0x4f4   :  { %1343 = vmatmul.mubr.msk.bf16.vlgmr.msra.gmra.mrb[8].mxu1 %vm108_vm3, %v1640_v4 }
 0x4f5   :  { %1356 = vmatprep.mubr.msk.bf16.mxu1 %vm1583_vm0, %v1582_v0 }
 0x5c7   :  { %v412_v18 = vpop.f32.mrb[8].mxu1 }
 0x5c8   :  { %v1344_v19 = vpop.f32.mrb[9].mxu1 }
 0x5c9   :  { %v415_v20 = vpop.f32.mrb[10].mxu1 }
 0x5ca   :  { %v419_v21 = vpack.c.bf16 %v415_v20, %v412_v18  ;;  %v1345_v22 = vpop.f32.mrb[11].mxu1 }
 0x5cc   :  { %1351 = vmatmul.mubr.msk.bf16.vlgmr.msra.gmra.mrb[12].mxu0 %vm167_vm4, %v419_v21 }
 0x5cd   :  { %1361 = vmatpush3.bf16.msra.mxu0 %v1672_v46  ;;  %1364 = vmatprep.mubr.msk.bf16.mxu0 %vm1583_vm0, %v1582_v0 }
 0x5ce   :  { %1362 = vmatprep.subr.bf16.mxu0 %v1582_v0 }
 0x5d1   :  { %1363 = vmatpush3.bf16.msra.mxu0 %v1682_v52 }
 0x5d2   :  { %1374 = vmatprep.subr.bf16.mxu0 %v1582_v0 }
 0x69f   :  { %v457_v23 = vpop.f32.mrb[12].mxu0 }
 0x6a0   :  { %v458_v24 = vadd.f32 %v1705_v2, %v457_v23  ;;  %v1352_v25 = vpop.f32.mrb[13].mxu0 }
 0x6a1   :  { %v460_v26 = vpop.f32.mrb[14].mxu0 }
 0x6a2   :  { %1478 = vtanh.f32 %v458_v24  ;;  %v461_v27 = vadd.f32 %v1705_v2, %v460_v26  ;;  %v1353_v28 = vpop.f32.mrb[15].mxu0 }
 0x6a4   :  { %1480 = vtanh.f32 %v461_v27 }
 0x6ac   :  { %v1479_v29 = vpop.eup %1478 }
 0x6ad   :  { %v466_v30 = vmul.f32 %v1479_v29, %v1712_v10 }
 0x6ae   :  { %v1481_v31 = vpop.eup %1480 }
 0x6af   :  { %v467_v32 = vmul.f32 %v1481_v31, %v1712_v10  ;;  %v468_v33 = vadd.f32 %v466_v30, %v375_v15 }
 0x6b1   :  { %v469_v34 = vadd.f32 %v467_v32, %v376_v16 }
 0x6b3   :  { %v470_v35 = vpack.c.bf16 %v469_v34, %v468_v33 }
 0x6b5   :  { %1355 = vmatpush3.bf16.msra.mxu1 %v470_v35 }
 0x6b6   :  { %1368 = vmatprep.subr.bf16.mxu1 %v1582_v0 }
 0x6b8   :  { %1357 = vmatmul.mubr.msk.bf16.vlgmr.msra.gmra.mrb[12].mxu1 %vm108_vm3, %v1640_v4 }
 0x6b9   :  { %1370 = vmatprep.mubr.msk.bf16.mxu1 %vm1583_vm0, %v1582_v0 }
 0x78b   :  { %v505_v36 = vpop.f32.mrb[12].mxu1 }
 0x78c   :  { %v1358_v37 = vpop.f32.mrb[13].mxu1 }
 0x78d   :  { %v508_v38 = vpop.f32.mrb[14].mxu1 }
 0x78e   :  { %v512_v39 = vpack.c.bf16 %v508_v38, %v505_v36  ;;  %v1359_v40 = vpop.f32.mrb[15].mxu1 }
 0x790   :  { %1365 = vmatmul.mubr.msk.bf16.vlgmr.msra.gmra.mrb[16].mxu0 %vm167_vm4, %v512_v39 }
 0x791   :  { %1375 = vmatpush3.bf16.msra.mxu0 %v1672_v46  ;;  %1378 = vmatprep.mubr.msk.bf16.mxu0 %vm1583_vm0, %v1582_v0 }
 0x792   :  { %1376 = vmatprep.subr.bf16.mxu0 %v1582_v0 }
 0x795   :  { %1377 = vmatpush3.bf16.msra.mxu0 %v1682_v52 }
 0x796   :  { %1388 = vmatprep.subr.bf16.mxu0 %v1582_v0 }
 0x863   :  { %v550_v41 = vpop.f32.mrb[16].mxu0 }
 0x864   :  { %v551_v42 = vadd.f32 %v1705_v2, %v550_v41  ;;  %v1366_v43 = vpop.f32.mrb[17].mxu0 }
 0x865   :  { %v553_v44 = vpop.f32.mrb[18].mxu0 }
 0x866   :  { %1482 = vtanh.f32 %v551_v42  ;;  %v554_v45 = vadd.f32 %v1705_v2, %v553_v44  ;;  %v1367_v47 = vpop.f32.mrb[19].mxu0 }
 0x868   :  { %1484 = vtanh.f32 %v554_v45 }
 0x870   :  { %v1483_v48 = vpop.eup %1482 }
 0x871   :  { %v559_v49 = vmul.f32 %v1483_v48, %v1712_v10 }
 0x872   :  { %v1485_v50 = vpop.eup %1484 }
 0x873   :  { %v560_v51 = vmul.f32 %v1485_v50, %v1712_v10  ;;  %v561_v53 = vadd.f32 %v559_v49, %v468_v33 }
 0x875   :  { %v562_v55 = vadd.f32 %v560_v51, %v469_v34 }
 0x877   :  { %v563_v57 = vpack.c.bf16 %v562_v55, %v561_v53 }
 0x879   :  { %1369 = vmatpush3.bf16.msra.mxu1 %v563_v57 }
 0x87a   :  { %1382 = vmatprep.subr.bf16.mxu1 %v1582_v0 }
 0x87c   :  { %1371 = vmatmul.mubr.msk.bf16.vlgmr.msra.gmra.mrb[16].mxu1 %vm108_vm3, %v1640_v4 }
 0x87d   :  { %1384 = vmatprep.mubr.msk.bf16.mxu1 %vm1583_vm0, %v1582_v0 }
 0x94f   :  { %v598_v58 = vpop.f32.mrb[16].mxu1 }
 0x950   :  { %v1372_v60 = vpop.f32.mrb[17].mxu1 }
 0x951   :  { %v601_v61 = vpop.f32.mrb[18].mxu1 }
 0x952   :  { %v605_v62 = vpack.c.bf16 %v601_v61, %v598_v58  ;;  %v1373_v63 = vpop.f32.mrb[19].mxu1 }
 0x954   :  { %1379 = vmatmul.mubr.msk.bf16.vlgmr.msra.gmra.mrb[20].mxu0 %vm167_vm4, %v605_v62 }
 0x955   :  { %1389 = vmatpush3.bf16.msra.mxu0 %v1672_v46  ;;  %1392 = vmatprep.mubr.msk.bf16.mxu0 %vm1583_vm0, %v1582_v0 }
 0x956   :  { %1390 = vmatprep.subr.bf16.mxu0 %v1582_v0 }
 0x959   :  { %1391 = vmatpush3.bf16.msra.mxu0 %v1682_v52 }
 0x95a   :  { %1402 = vmatprep.subr.bf16.mxu0 %v1582_v0 }
 0xa27   :  { %v643_v1 = vpop.f32.mrb[20].mxu0 }
 0xa28   :  { %v644_v3 = vadd.f32 %v1705_v2, %v643_v1  ;;  %v1380_v5 = vpop.f32.mrb[21].mxu0 }
 0xa29   :  { %v646_v6 = vpop.f32.mrb[22].mxu0 }
 0xa2a   :  { %1486 = vtanh.f32 %v644_v3  ;;  %v647_v7 = vadd.f32 %v1705_v2, %v646_v6  ;;  %v1381_v8 = vpop.f32.mrb[23].mxu0 }
 0xa2c   :  { %1488 = vtanh.f32 %v647_v7 }
 0xa34   :  { %v1487_v9 = vpop.eup %1486 }
 0xa35   :  { %v652_v11 = vmul.f32 %v1487_v9, %v1712_v10 }
 0xa36   :  { %v1489_v12 = vpop.eup %1488 }
 0xa37   :  { %v653_v13 = vmul.f32 %v1489_v12, %v1712_v10  ;;  %v654_v14 = vadd.f32 %v652_v11, %v561_v53 }
 0xa39   :  { %v655_v15 = vadd.f32 %v653_v13, %v562_v55 }
 0xa3b   :  { %v656_v16 = vpack.c.bf16 %v655_v15, %v654_v14 }
 0xa3d   :  { %1383 = vmatpush3.bf16.msra.mxu1 %v656_v16 }
 0xa3e   :  { %1396 = vmatprep.subr.bf16.mxu1 %v1582_v0 }
 0xa40   :  { %1385 = vmatmul.mubr.msk.bf16.vlgmr.msra.gmra.mrb[20].mxu1 %vm108_vm3, %v1640_v4 }
 0xa41   :  { %1398 = vmatprep.mubr.msk.bf16.mxu1 %vm1583_vm0, %v1582_v0 }
 0xb13   :  { %v691_v17 = vpop.f32.mrb[20].mxu1 }
 0xb14   :  { %v1386_v18 = vpop.f32.mrb[21].mxu1 }
 0xb15   :  { %v694_v19 = vpop.f32.mrb[22].mxu1 }
 0xb16   :  { %v698_v20 = vpack.c.bf16 %v694_v19, %v691_v17  ;;  %v1387_v21 = vpop.f32.mrb[23].mxu1 }
 0xb17   :  { %v1029_v21 = vld [vmem:[#allocation6 + $0x50] sm:$0xff] }
 0xb18   :  { %1393 = vmatmul.mubr.msk.bf16.vlgmr.msra.gmra.mrb[24].mxu0 %vm167_vm4, %v698_v20  ;;  %v1028_v20 = vld [vmem:[#allocation6 + $0x48] sm:$0xff] }
 0xb19   :  { %1403 = vmatpush3.bf16.msra.mxu0 %v1672_v46  ;;  %1406 = vmatprep.mubr.msk.bf16.mxu0 %vm1583_vm0, %v1582_v0 }
 0xb1a   :  { %1404 = vmatprep.subr.bf16.mxu0 %v1582_v0 }
 0xb1d   :  { %1405 = vmatpush3.bf16.msra.mxu0 %v1682_v52 }
 0xb1e   :  { %1416 = vmatprep.subr.bf16.mxu0 %v1582_v0 }
 0xbeb   :  { %v736_v22 = vpop.f32.mrb[24].mxu0 }
 0xbec   :  { %v737_v23 = vadd.f32 %v1705_v2, %v736_v22  ;;  %v1394_v24 = vpop.f32.mrb[25].mxu0  ;;  %v1032_v22 = vpack.c.bf16 %v1029_v21, %v1028_v20 }
 0xbed   :  { %v739_v25 = vpop.f32.mrb[26].mxu0  ;;  %v1031_v24 = vld [vmem:[#allocation6 + $0x60] sm:$0xff] }
 0xbee   :  { %1490 = vtanh.f32 %v737_v23  ;;  %v740_v26 = vadd.f32 %v1705_v2, %v739_v25  ;;  %v1395_v27 = vpop.f32.mrb[27].mxu0  ;;  %v1030_v23 = vld [vmem:[#allocation6 + $0x58] sm:$0xff] }
 0xbef   :  { %v1033_v25 = vpack.c.bf16 %v1031_v24, %v1030_v23 }
 0xbf0   :  { %1492 = vtanh.f32 %v740_v26 }
 0xbf8   :  { %v1491_v28 = vpop.eup %1490 }
 0xbf9   :  { %v745_v29 = vmul.f32 %v1491_v28, %v1712_v10 }
 0xbfa   :  { %v1493_v30 = vpop.eup %1492 }
 0xbfb   :  { %v746_v31 = vmul.f32 %v1493_v30, %v1712_v10  ;;  %v747_v32 = vadd.f32 %v745_v29, %v654_v14  ;;  %v1035_v14 = vpack.c.bf16 %v1690_v56, %v1687_v54 }
 0xbfd   :  { %v748_v33 = vadd.f32 %v746_v31, %v655_v15 }
 0xbff   :  { %v749_v34 = vpack.c.bf16 %v748_v33, %v747_v32 }
 0xc01   :  { %1397 = vmatpush3.bf16.msra.mxu1 %v749_v34 }
 0xc02   :  { %1410 = vmatprep.subr.bf16.mxu1 %v1582_v0 }
 0xc04   :  { %1399 = vmatmul.mubr.msk.bf16.vlgmr.msra.gmra.mrb[24].mxu1 %vm108_vm3, %v1640_v4 }
 0xc05   :  { %1412 = vmatprep.mubr.msk.bf16.mxu1 %vm1583_vm0, %v1582_v0 }
 0xcd7   :  { %v784_v35 = vpop.f32.mrb[24].mxu1 }
 0xcd8   :  { %v1400_v36 = vpop.f32.mrb[25].mxu1 }
 0xcd9   :  { %v787_v37 = vpop.f32.mrb[26].mxu1 }
 0xcda   :  { %v791_v38 = vpack.c.bf16 %v787_v37, %v784_v35  ;;  %v1401_v39 = vpop.f32.mrb[27].mxu1 }
 0xcdc   :  { %1407 = vmatmul.mubr.msk.bf16.vlgmr.msra.gmra.mrb[28].mxu0 %vm167_vm4, %v791_v38 }
 0xcdd   :  { %1417 = vmatpush3.bf16.msra.mxu0 %v1672_v46  ;;  %1420 = vmatprep.mubr.msk.bf16.mxu0 %vm1583_vm0, %v1582_v0 }
 0xcde   :  { %1418 = vmatprep.subr.bf16.mxu0 %v1582_v0 }
 0xce1   :  { %1419 = vmatpush3.bf16.msra.mxu0 %v1682_v52 }
 0xce2   :  { %1430 = vmatprep.subr.bf16.mxu0 %v1582_v0 }
 0xdaf   :  { %v829_v40 = vpop.f32.mrb[28].mxu0 }
 0xdb0   :  { %v830_v41 = vadd.f32 %v1705_v2, %v829_v40  ;;  %v1408_v42 = vpop.f32.mrb[29].mxu0 }
 0xdb1   :  { %v832_v43 = vpop.f32.mrb[30].mxu0 }
 0xdb2   :  { %1494 = vtanh.f32 %v830_v41  ;;  %v833_v44 = vadd.f32 %v1705_v2, %v832_v43  ;;  %v1409_v45 = vpop.f32.mrb[31].mxu0 }
 0xdb4   :  { %1496 = vtanh.f32 %v833_v44 }
 0xdbc   :  { %v1495_v47 = vpop.eup %1494 }
 0xdbd   :  { %v838_v48 = vmul.f32 %v1495_v47, %v1712_v10  ;;  %v1248_v47 = vld [vmem:[#allocation6 + $0x6b] ss:$0 sm:$0xff] }
 0xdbe   :  { %v1497_v49 = vpop.eup %1496 }
 0xdbf   :  { %v839_v50 = vmul.f32 %v1497_v49, %v1712_v10  ;;  %v840_v51 = vadd.f32 %v838_v48, %v747_v32 }
 0xdc1   :  { %v841_v53 = vadd.f32 %v839_v50, %v748_v33 }
 0xdc3   :  { %v842_v55 = vpack.c.bf16 %v841_v53, %v840_v51 }
 0xdc5   :  { %1411 = vmatpush3.bf16.msra.mxu1 %v842_v55 }
 0xdc6   :  { %1424 = vmatprep.subr.bf16.mxu1 %v1582_v0 }
 0xdc8   :  { %1413 = vmatmul.mubr.msk.bf16.vlgmr.msra.gmra.mrb[28].mxu1 %vm108_vm3, %v1640_v4 }
 0xdc9   :  { %1426 = vmatprep.mubr.msk.bf16.mxu1 %vm1583_vm0, %v1582_v0 }
 0xe9b   :  { %v877_v57 = vpop.f32.mrb[28].mxu1 }
 0xe9c   :  { %v1414_v58 = vpop.f32.mrb[29].mxu1 }
 0xe9d   :  { %v880_v60 = vpop.f32.mrb[30].mxu1 }
 0xe9e   :  { %v884_v61 = vpack.c.bf16 %v880_v60, %v877_v57  ;;  %v1415_v62 = vpop.f32.mrb[31].mxu1 }
 0xea0   :  { %1421 = vmatmul.mubr.msk.bf16.vlgmr.msra.gmra.mrb[32].mxu0 %vm167_vm4, %v884_v61 }
 0xea1   :  { %1431 = vmatpush3.bf16.msra.mxu0 %v1672_v46  ;;  %1434 = vmatprep.mubr.msk.bf16.mxu0 %vm1583_vm0, %v1582_v0 }
 0xea2   :  { %1432 = vmatprep.subr.bf16.mxu0 %v1582_v0 }
 0xea5   :  { %1433 = vmatpush3.bf16.msra.mxu0 %v1682_v52 }
 0xea6   :  { %1446 = vmatprep.subr.bf16.mxu0 %v1582_v0 }
 0xf73   :  { %v922_v63 = vpop.f32.mrb[32].mxu0 }
 0xf74   :  { %v923_v1 = vadd.f32 %v1705_v2, %v922_v63  ;;  %v1422_v3 = vpop.f32.mrb[33].mxu0 }
 0xf75   :  { %v925_v5 = vpop.f32.mrb[34].mxu0  ;;  %v252_v3 = vpop.permute.xlu1 %251 }
 0xf76   :  { %1498 = vtanh.f32 %v923_v1  ;;  %v926_v6 = vadd.f32 %v1705_v2, %v925_v5  ;;  %v1423_v7 = vpop.f32.mrb[35].mxu0  ;;  %v254_v5 = vpop.permute.xlu0 %253 }
 0xf78   :  { %1500 = vtanh.f32 %v926_v6 }
 0xf80   :  { %v1499_v46 = vpop.eup %1498 }
 0xf81   :  { %v931_v8 = vmul.f32 %v1499_v46, %v1712_v10 }
 0xf82   :  { %v1501_v9 = vpop.eup %1500 }
 0xf83   :  { %v932_v11 = vmul.f32 %v1501_v9, %v1712_v10  ;;  %v933_v12 = vadd.f32 %v931_v8, %v840_v51  ;;  %v261_v8 = vsel %vm167_vm4, %v1687_v54, %v252_v3  ;;  %v262_v9 = vsel %vm167_vm4, %v1690_v56, %v254_v5 }
 0xf84   :  { %v265_v54 = vsel %vm263_vm7, %v262_v9, %v254_v5 }
 0xf85   :  { %v934_v52 = vadd.f32 %v932_v11, %v841_v53 }
 0xf87   :  { %v935_v13 = vpack.c.bf16 %v934_v52, %v933_v12 }
 0xf89   :  { %1425 = vmatpush3.bf16.msra.mxu1 %v935_v13 }
 0xf8a   :  { %1438 = vmatprep.subr.bf16.mxu1 %v1032_v22 }
 0xf8c   :  { %1427 = vmatmul.mubr.msk.bf16.vlgmr.msra.gmra.mrb[32].mxu1 %vm108_vm3, %v1640_v4 }
 0xf8d   :  { %1442 = vmatprep.mubr.msk.bf16.mxu1 %vm167_vm4, %v1035_v14  ;;  %1439 = vmatpush3.bf16.msra.mxu1 %v1032_v22 }
 0xf8e   :  { %1440 = vmatprep.subr.bf16.mxu1 %v1033_v25 }
 0xf91   :  { %1441 = vmatpush3.bf16.msra.mxu1 %v1033_v25 }
 0xf92   :  { %1452 = vmatprep.subr.bf16.mxu1 %v1582_v0 }
0x105f   :  { %v970_v15 = vpop.f32.mrb[32].mxu1 }
0x1060   :  { %v1428_v16 = vpop.f32.mrb[33].mxu1 }
0x1061   :  { %v973_v17 = vpop.f32.mrb[34].mxu1 }
0x1062   :  { %v977_v18 = vpack.c.bf16 %v973_v17, %v970_v15  ;;  %v1429_v19 = vpop.f32.mrb[35].mxu1  ;;  %v264_v15 = vsel %vm263_vm7, %v261_v8, %v252_v3 }
0x1064   :  { %1435 = vmatmul.mubr.msk.bf16.vlgmr.msra.gmra.mrb[36].mxu0 %vm167_vm4, %v977_v18 }
0x1065   :  { %1448 = vmatprep.mubr.msk.bf16.mxu0 %vm1583_vm0, %v1582_v0 }
0x1137   :  { %v1015_v26 = vpop.f32.mrb[36].mxu0 }
0x1138   :  { %v1016_v27 = vadd.f32 %v1705_v2, %v1015_v26  ;;  %v1436_v28 = vpop.f32.mrb[37].mxu0 }
0x1139   :  { %v1018_v29 = vpop.f32.mrb[38].mxu0 }
0x113a   :  { %1502 = vtanh.f32 %v1016_v27  ;;  %v1019_v30 = vadd.f32 %v1705_v2, %v1018_v29  ;;  %v1437_v31 = vpop.f32.mrb[39].mxu0 }
0x113c   :  { %1504 = vtanh.f32 %v1019_v30 }
0x1144   :  { %v1503_v32 = vpop.eup %1502 }
0x1145   :  { %v1024_v33 = vmul.f32 %v1503_v32, %v1712_v10 }
0x1146   :  { %v1505_v34 = vpop.eup %1504 }
0x1147   :  { %v1025_v35 = vmul.f32 %v1505_v34, %v1712_v10  ;;  %v1026_v36 = vadd.f32 %v1024_v33, %v933_v12  ;;  %v241_v10 = vrot.slane %v1696_v59, 4 }
0x1149   :  { %v1027_v37 = vadd.f32 %v1025_v35, %v934_v52  ;;  %v242_v44 = vadd.f32 %v241_v10, %v1696_v59 }
0x114b   :  { %v1036_v38 = vpack.c.bf16 %v1027_v37, %v1026_v36  ;;  %v243_v45 = vrot.slane %v242_v44, 2 }
0x114d   :  { %1443 = vmatmul.mubr.msk.bf16.vlgmr.msra.gmra.mrb[36].mxu1 %vm167_vm4, %v1036_v38 }
0x114e   :  { %1454 = vmatprep.mubr.msk.bf16.mxu1 %vm1583_vm0, %v1582_v0  ;;  %v244_v0 = vadd.f32 %v243_v45, %v242_v44 }
0x1150   :  { %v245_v53 = vrot.slane %v244_v0, 1 }
0x1152   :  { %v246_v63 = vadd.f32 %v245_v53, %v244_v0 }
0x1154   :  { %v248_v1 = vmul.f32 0.0625, %v246_v63 }
0x1220   :  { %v1444_v39 = vpop.f32.mrb[36].mxu1 }
0x1221   :  { %v1077_v40 = vpop.f32.mrb[37].mxu1 }
0x1222   :  { %v1445_v41 = vpop.f32.mrb[38].mxu1 }
0x1223   :  { %v1138_v2 = vpack.c.bf16 %v1445_v41, %v1444_v39  ;;  %v1080_v42 = vpop.f32.mrb[39].mxu1 }
0x1224   :  { %v1092_v43 = vpack.c.bf16 %v1080_v42, %v1077_v40 }
0x1225   :  { %1453 = vmatpush3.bf16.msra.mxu1 %v1138_v2 }
0x1226   :  { %1447 = vmatpush3.bf16.msra.mxu0 %v1092_v43 }
0x1228   :  { %1455 = vmatmul.mubr.msk.bf16.vlgmr.msra.gmra.mrb[40].mxu1 %vm108_vm3, %v1640_v4 }
0x1229   :  { %1449 = vmatmul.mubr.msk.bf16.vlgmr.msra.gmra.mrb[40].mxu0 %vm108_vm3, %v1640_v4 }
0x12fb   :  { %v1173_v48 = vpop.f32.mrb[40].mxu1 }
0x12fc   :  { %v1174_v49 = vadd.f32 %v1248_v47, %v1173_v48  ;;  %v1131_v50 = vpop.f32.mrb[40].mxu0  ;;  %v1456_v51 = vpop.f32.mrb[41].mxu1 }
0x12fd   :  { %v1450_v55 = vpop.f32.mrb[41].mxu0  ;;  %v1176_v57 = vpop.f32.mrb[42].mxu1  ;;  %v1132_v62 = vadd.f32 %v1248_v47, %v1131_v50 }
0x12fe   :  { %1190 = vrot.lane.b32.xlu1 %v1174_v49, %s1586_s0  ;;  %v1134_v58 = vpop.f32.mrb[42].mxu0  ;;  %v1457_v60 = vpop.f32.mrb[43].mxu1  ;;  %v1177_v59 = vadd.f32 %v1248_v47, %v1176_v57 }
0x12ff   :  { %v1135_v61 = vadd.f32 %v1248_v47, %v1134_v58  ;;  %v1451_v4 = vpop.f32.mrb[43].mxu0 }
0x1301   :  { %1184 = vrot.lane.b32.xlu0 %v1135_v61, %s1585_s10 }
0x1302   :  { %1182 = vrot.lane.b32.xlu1 %v1132_v62, %s1585_s10 }
0x1305   :  { %1192 = vrot.lane.b32.xlu0 %v1177_v59, %s1586_s0 }
0x1306   :  { %258 = vrot.lane.b32.xlu1 %v248_v1, %s1584_s2 }
0x1370   :  { %v1191_v6 = vpop.permute.xlu1 %1190 }
0x1373   :  { %v1185_v7 = vpop.permute.xlu0 %1184 }
0x1374   :  { %v1183_v46 = vpop.permute.xlu1 %1182  ;;  %v1197_v52 = vsel %vm167_vm4, %v1027_v37, %v1185_v7 }
0x1375   :  { %v1196_v11 = vsel %vm167_vm4, %v1026_v36, %v1183_v46 }
0x1376   :  { %v1199_v12 = vsel %vm1198_vm5, %v1196_v11, %v1191_v6 }
0x1377   :  { %v1202_v13 = vsel %vm1201_vm6, %v1199_v12, 0.0  ;;  %v1193_v14 = vpop.permute.xlu0 %1192 }
0x1378   :  { %1204 = vst [vmem:[#allocation8 + $0x8] sm:$0xff] %v1202_v13  ;;  %v1200_v56 = vsel %vm1198_vm5, %v1197_v52, %v1193_v14  ;;  %v259_v16 = vpop.permute.xlu1 %258 }
0x1379   :  { %v1203_v17 = vsel %vm1201_vm6, %v1200_v56, 0.0  ;;  %v267_v18 = vsel %vm266_vm8, %v264_v15, %v259_v16  ;;  %v268_v19 = vsel %vm266_vm8, %v265_v54, %v259_v16 }
0x137a   :  { %1205 = vst [vmem:[#allocation8 + $0x18] sm:$0xff] %v1203_v17  ;;  %269 = vst [vmem:[#allocation8] sm:$0xff] %v267_v18 }
0x137b   :  { %270 = vst [vmem:[#allocation8 + $0x10] sm:$0xff] %v268_v19 }
0x137c   :  { %1561 = shalt.err (!%p1558_p6)
}
0x137d   :  { %s1562_s18 = scalar_lea.hbm %s1871_s3, 512 }
0x137e   :  { %p1563_p7 = scmp.ne.s32.totalorder %s1871_s3, %s1562_s18  ;;  %p1566_p8 = scmp.lt.u32.totalorder %s1562_s18, %s1871_s3 }
0x1380   :  { %p1568_p9 = pnand %p1566_p8, %p1563_p7 }
0x1382   :  { %1571 = shalt.err (!%p1568_p9)
}
0x1383   :  { %s1588_s23 = smov 256   ;;  %s1589_s24 = smov 16  }
0x1384   :  { %1217 = dma.vmem_to_hbm [thread:$0]  %s1847_s14, 512, %s1871_s3, [#allocation5], %s1588_s23, %s1588_s23, %s1589_s24  }
0x1385   :  { %1576 = dma.done.wait [#allocation5], 512  }
0x1386   :  { %1577 = vsyncadd [#allocation5], 4294966784 }
0x1387   :  { %1221 = vsyncpa [#allocation4], 1 }
0x1388   :  { %1222 = vsyncpa [#allocation7], 1 }
0x1389   :  { %1223 = vsyncpa [#allocation5], 1 }

</bundles_post_ra>
